<compile_context>
chip_gen: v7x
topology: tpu7x:2x2x1
jax: 0.10.0
libtpu: 0.0.40
codegen_flags: <defaults>
</compile_context>

<pallas_src>
import math

import jax
import jax.numpy as jnp
from jax.experimental import pallas as pl
from jax.experimental.pallas import tpu as pltpu


def _make_kernel(Hh, Cin, Wp, Nb):
    """Kernel factory, closed over static geometry."""
    Kc = (Wp - 1) * Cin          # K per row-tap block (columns x Cin)
    M = Nb * Hh                  # pooled output rows per grid step

    def kernel(x_ref, w_ref, shift_ref, o_ref):
        # x_ref:     (4, Nb*Hh, Wp*Cin)  bf16  row-parity slabs: slab s, row (n,hh) = padded row 2*hh+s
        # w_ref:     (3, Kc, Wh*Cout)    bf16  shared strided block-diag weights (BN scale folded)
        # shift_ref: (1, Wh*Cout)        f32   conv bias + BN shift, tiled over Wh
        # o_ref:     (Nb*Hh, Wh*Cout)    bf16  pooled + ReLU output
        slabs = [x_ref[s] for s in range(4)]

        def stacked_lhs(dy):
            # Stack the four 2x2 pool-window positions (oy, ox) along M.  Row shifts come from
            # the slab index (oy + dy); column shifts (ox) are static lane slices, so a single
            # weight block serves all four positions.
            pieces = []
            for oy in range(2):
                s = slabs[oy + dy]
                for ox in range(2):
                    pieces.append(s[:, ox * Cin: ox * Cin + Kc])
            return jnp.concatenate(pieces, axis=0)                        # (4*M, Kc) bf16

        # 3 bf16 MXU dots per grid step (was 36 f32 dots), accumulated in f32.
        acc = jnp.dot(stacked_lhs(0), w_ref[0], preferred_element_type=jnp.float32)
        for dy in (1, 2):
            acc = acc + jnp.dot(stacked_lhs(dy), w_ref[dy],
                                preferred_element_type=jnp.float32)       # (4*M, Wh*Cout)

        # 2x2 max-pool == elementwise max over the four stacked row groups; the per-channel
        # shift and ReLU commute with the max, so apply them once afterwards.
        pooled = jnp.maximum(jnp.maximum(acc[0:M], acc[M:2 * M]),
                             jnp.maximum(acc[2 * M:3 * M], acc[3 * M:4 * M]))
        y = jnp.maximum(pooled + shift_ref[...], 0.0)
        o_ref[...] = y.astype(o_ref.dtype)

    return kernel


def _pack_weights(conv_w, conv_b, bn_gamma, bn_beta, bn_mean, bn_var, eps, W):
    """Fold eval-mode BN into the conv weights and build the shared rhs / shift.

    Depends only on parameters (not activations) -- in a real model build once per weight
    set and cache instead of recomputing every forward call.
    """
    Cout, Cin = conv_w.shape[0], conv_w.shape[1]
    Wh = W // 2
    Wp = W + 2
    Wpm1 = Wp - 1

    inv_std = 1.0 / jnp.sqrt(bn_var.astype(jnp.float32) + eps)
    scale = bn_gamma.astype(jnp.float32) * inv_std                                  # (Cout,)
    shift = bn_beta.astype(jnp.float32) + \
        (conv_b.astype(jnp.float32) - bn_mean.astype(jnp.float32)) * scale          # (Cout,)
    w_t = jnp.transpose(conv_w.astype(jnp.float32), (2, 3, 1, 0)) * scale           # (3,3,Cin,Cout)

    # rhs[dy, col*Cin + ci, ww*Cout + co] = w_t[dy, col - 2*ww, ci, co]  if 0 <= col-2ww <= 2
    blocks = []
    for dy in range(3):
        blk = jnp.zeros((Wpm1 * Cin, Wh * Cout), jnp.float32)
        for dx in range(3):
            sel = jnp.eye(Wpm1, 2 * Wh, k=-dx, dtype=jnp.float32)[:, ::2]           # (Wpm1, Wh)
            blk = blk + jnp.kron(sel, w_t[dy, dx])                                   # (Wpm1*Cin, Wh*Cout)
        blocks.append(blk)
    rhs = jnp.stack(blocks, axis=0).astype(jnp.bfloat16)                             # (3, Wpm1*Cin, Wh*Cout)
    shift_tiled = jnp.tile(shift, (Wh,))[None, :]                                    # (1, Wh*Cout) f32
    return rhs, shift_tiled


def conv_block_forward(x_nchw, conv_w, conv_b, bn_gamma, bn_beta, bn_mean, bn_var,
                       eps=1e-5, padding=1, block_batch=None):
    N, Cin, H, W = x_nchw.shape
    Cout = conv_w.shape[0]
    assert padding == 1 and tuple(conv_w.shape[2:]) == (3, 3), "specialized to 3x3 conv, padding=1"
    assert H % 2 == 0 and W % 2 == 0, "even spatial dims assumed (MaxPool2d(2))"
    Hh, Wh = H // 2, W // 2
    Wp = W + 2

    # Images per grid step (batch folded into the dot's M dimension).
    if block_batch is None:
        block_batch = max(d for d in range(1, min(N, 8) + 1) if N % d == 0)
    Nb = block_batch
    assert N % Nb == 0
    assert (Nb * Hh) % 8 == 0 or N == Nb, "row block must be sublane-aligned"

    # ---- activations: NCHW -> padded NHWC (bf16) -> four row-parity slabs -------------------
    x = jnp.transpose(x_nchw, (0, 2, 3, 1)).astype(jnp.bfloat16)                     # (N,H,W,Cin)
    x_pad = jnp.pad(x, ((0, 0), (1, 1), (1, 1), (0, 0)))                             # (N,H+2,Wp,Cin)
    # slab[s][n, hh, :] = x_pad[n, 2*hh + s, :, :]   for s in [0,4), hh in [0,Hh)
    xq = jnp.stack([x_pad[:, s:s + 2 * Hh:2] for s in range(4)], axis=0)             # (4,N,Hh,Wp,Cin)
    xq = xq.reshape(4, N * Hh, Wp * Cin)

    # ---- weights (build once per weight set; cache in a real model) -------------------------
    rhs, shift_tiled = _pack_weights(conv_w, conv_b, bn_gamma, bn_beta, bn_mean, bn_var, eps, W)
    Kc = rhs.shape[1]

    kernel = _make_kernel(Hh, Cin, Wp, Nb)
    out = pl.pallas_call(
        kernel,
        out_shape=jax.ShapeDtypeStruct((N * Hh, Wh * Cout), jnp.bfloat16),
        grid=(N // Nb,),
        in_specs=[
            pl.BlockSpec((4, Nb * Hh, Wp * Cin), lambda b: (0, b, 0)),
            pl.BlockSpec((3, Kc, Wh * Cout), lambda b: (0, 0, 0)),   # constant -> resident in VMEM
            pl.BlockSpec((1, Wh * Cout), lambda b: (0, 0)),
        ],
        out_specs=pl.BlockSpec((Nb * Hh, Wh * Cout), lambda b: (b, 0)),
        compiler_params=pltpu.CompilerParams(dimension_semantics=("parallel",)),
    )(xq, rhs, shift_tiled)

    # (N*Hh, Wh*Cout) bf16 -> (N, Cout, Hh, Wh) f32 (module's output dtype).
    out = out.reshape(N, Hh, Wh, Cout).astype(jnp.float32)
    return jnp.transpose(out, (0, 3, 1, 2))


def _reference(x_nchw, conv_w, conv_b, bn_gamma, bn_beta, bn_mean, bn_var, eps=1e-5):
    # Pure-JAX f32 reference: conv -> BN(eval) -> ReLU -> maxpool 2x2, NCHW.
    z = jax.lax.conv_general_dilated(
        x_nchw, conv_w, window_strides=(1, 1), padding=((1, 1), (1, 1)),
        dimension_numbers=("NCHW", "OIHW", "NCHW"))
    z = z + conv_b[None, :, None, None]
    z = (z - bn_mean[None, :, None, None]) / jnp.sqrt(bn_var + eps)[None, :, None, None]
    z = z * bn_gamma[None, :, None, None] + bn_beta[None, :, None, None]
    z = jnp.maximum(z, 0.0)
    return jax.lax.reduce_window(z, -jnp.inf, jax.lax.max,
                                 (1, 1, 2, 2), (1, 1, 2, 2), "VALID")


if __name__ == "__main__":
    N, Cin, Cout, H, W = 2, 4, 8, 16, 16

    key = jax.random.PRNGKey(0)
    kx, kw, kb = jax.random.split(key, 3)

    x = jax.random.normal(kx, (N, Cin, H, W), dtype=jnp.float32)

    # init_layer: conv weight ~ N(0, sqrt(2 / (k*k*outdim)))
    std = math.sqrt(2.0 / float(3 * 3 * Cout))
    conv_w = std * jax.random.normal(kw, (Cout, Cin, 3, 3), dtype=jnp.float32)
    # conv bias keeps PyTorch's default uniform init (deterministic here)
    bound = 1.0 / math.sqrt(Cin * 3 * 3)
    conv_b = jax.random.uniform(kb, (Cout,), minval=-bound, maxval=bound, dtype=jnp.float32)

    # init_layer: BN weight = 1, bias = 0; running stats at their defaults.
    bn_gamma = jnp.ones((Cout,), jnp.float32)
    bn_beta = jnp.zeros((Cout,), jnp.float32)
    bn_mean = jnp.zeros((Cout,), jnp.float32)
    bn_var = jnp.ones((Cout,), jnp.float32)

    fwd = jax.jit(conv_block_forward)
    out = jax.block_until_ready(fwd(x, conv_w, conv_b, bn_gamma, bn_beta, bn_mean, bn_var))

    ref = _reference(x, conv_w, conv_b, bn_gamma, bn_beta, bn_mean, bn_var)
    assert out.shape == (N, Cout, H // 2, W // 2), out.shape
    assert out.dtype == jnp.float32
    # bf16 activations + bf16 weights + bf16 kernel output bound the error around ~1e-2 here.
    assert jnp.allclose(out, ref, rtol=3e-2, atol=3e-2), float(jnp.max(jnp.abs(out - ref)))

    print("KERNEL_OK")
</pallas_src>

<mosaic_0001>
module attributes {stable_mosaic.version = 11 : i64} {
  func.func @kernel(%arg0: i32, %arg1: memref<4x16x72xbf16, #tpu.memory_space<vmem>>, %arg2: memref<3x68x64xbf16, #tpu.memory_space<vmem>>, %arg3: memref<1x64xf32, #tpu.memory_space<vmem>>, %arg4: memref<16x64xbf16, #tpu.memory_space<vmem>>) attributes {dimension_semantics = [#tpu.dimension_semantics<parallel>], iteration_bounds = array<i64: 1>, scalar_prefetch = 0 : i64, scratch_operands = 0 : i64, tpu.core_type = #tpu.core_type<tc>, window_params = [{transform_indices = @transform_0, window_bounds = array<i64: 4, 16, 72>}, {pipeline_mode = #tpu.pipeline_mode<synchronous>, transform_indices = @transform_1, window_bounds = array<i64: 3, 68, 64>}, {pipeline_mode = #tpu.pipeline_mode<synchronous>, transform_indices = @transform_2, window_bounds = array<i64: 1, 64>}, {transform_indices = @transform_3, window_bounds = array<i64: 16, 64>}]} {
    %c0 = arith.constant 0 : index
    %c0_0 = arith.constant 0 : index
    %c0_1 = arith.constant 0 : index
    %0 = vector.load %arg1[%c0, %c0_0, %c0_1] : memref<4x16x72xbf16, #tpu.memory_space<vmem>>, vector<1x16x72xbf16>
    %1 = vector.shape_cast %0 : vector<1x16x72xbf16> to vector<16x72xbf16>
    %c1 = arith.constant 1 : index
    %c0_2 = arith.constant 0 : index
    %c0_3 = arith.constant 0 : index
    %2 = vector.load %arg1[%c1, %c0_2, %c0_3] : memref<4x16x72xbf16, #tpu.memory_space<vmem>>, vector<1x16x72xbf16>
    %3 = vector.shape_cast %2 : vector<1x16x72xbf16> to vector<16x72xbf16>
    %c2 = arith.constant 2 : index
    %c0_4 = arith.constant 0 : index
    %c0_5 = arith.constant 0 : index
    %4 = vector.load %arg1[%c2, %c0_4, %c0_5] : memref<4x16x72xbf16, #tpu.memory_space<vmem>>, vector<1x16x72xbf16>
    %5 = vector.shape_cast %4 : vector<1x16x72xbf16> to vector<16x72xbf16>
    %c3 = arith.constant 3 : index
    %c0_6 = arith.constant 0 : index
    %c0_7 = arith.constant 0 : index
    %6 = vector.load %arg1[%c3, %c0_6, %c0_7] : memref<4x16x72xbf16, #tpu.memory_space<vmem>>, vector<1x16x72xbf16>
    %7 = vector.shape_cast %6 : vector<1x16x72xbf16> to vector<16x72xbf16>
    %8 = vector.extract_strided_slice %1 {offsets = [0, 0], sizes = [16, 68], strides = [1, 1]} : vector<16x72xbf16> to vector<16x68xbf16>
    %9 = vector.extract_strided_slice %1 {offsets = [0, 4], sizes = [16, 68], strides = [1, 1]} : vector<16x72xbf16> to vector<16x68xbf16>
    %10 = vector.extract_strided_slice %3 {offsets = [0, 0], sizes = [16, 68], strides = [1, 1]} : vector<16x72xbf16> to vector<16x68xbf16>
    %11 = vector.extract_strided_slice %3 {offsets = [0, 4], sizes = [16, 68], strides = [1, 1]} : vector<16x72xbf16> to vector<16x68xbf16>
    %12 = tpu.concatenate %8, %9, %10, %11 in 0 : vector<16x68xbf16>, vector<16x68xbf16>, vector<16x68xbf16>, vector<16x68xbf16> -> vector<64x68xbf16>
    %c0_8 = arith.constant 0 : index
    %c0_9 = arith.constant 0 : index
    %c0_10 = arith.constant 0 : index
    %13 = vector.load %arg2[%c0_8, %c0_9, %c0_10] : memref<3x68x64xbf16, #tpu.memory_space<vmem>>, vector<1x68x64xbf16>
    %14 = vector.shape_cast %13 : vector<1x68x64xbf16> to vector<68x64xbf16>
    %cst = arith.constant dense<0.000000e+00> : vector<64x64xf32>
    %15 = tpu.matmul %12, %14, %cst {dimension_numbers = #tpu.dot_dimension_numbers<[1], [0], [0], [1], [0, 0, 1, 1], [], []>} : vector<64x68xbf16>, vector<68x64xbf16>, vector<64x64xf32> -> vector<64x64xf32>
    %16 = vector.extract_strided_slice %3 {offsets = [0, 0], sizes = [16, 68], strides = [1, 1]} : vector<16x72xbf16> to vector<16x68xbf16>
    %17 = vector.extract_strided_slice %3 {offsets = [0, 4], sizes = [16, 68], strides = [1, 1]} : vector<16x72xbf16> to vector<16x68xbf16>
    %18 = vector.extract_strided_slice %5 {offsets = [0, 0], sizes = [16, 68], strides = [1, 1]} : vector<16x72xbf16> to vector<16x68xbf16>
    %19 = vector.extract_strided_slice %5 {offsets = [0, 4], sizes = [16, 68], strides = [1, 1]} : vector<16x72xbf16> to vector<16x68xbf16>
    %20 = tpu.concatenate %16, %17, %18, %19 in 0 : vector<16x68xbf16>, vector<16x68xbf16>, vector<16x68xbf16>, vector<16x68xbf16> -> vector<64x68xbf16>
    %c1_11 = arith.constant 1 : index
    %c0_12 = arith.constant 0 : index
    %c0_13 = arith.constant 0 : index
    %21 = vector.load %arg2[%c1_11, %c0_12, %c0_13] : memref<3x68x64xbf16, #tpu.memory_space<vmem>>, vector<1x68x64xbf16>
    %22 = vector.shape_cast %21 : vector<1x68x64xbf16> to vector<68x64xbf16>
    %cst_14 = arith.constant dense<0.000000e+00> : vector<64x64xf32>
    %23 = tpu.matmul %20, %22, %cst_14 {dimension_numbers = #tpu.dot_dimension_numbers<[1], [0], [0], [1], [0, 0, 1, 1], [], []>} : vector<64x68xbf16>, vector<68x64xbf16>, vector<64x64xf32> -> vector<64x64xf32>
    %24 = arith.addf %15, %23 : vector<64x64xf32>
    %25 = vector.extract_strided_slice %5 {offsets = [0, 0], sizes = [16, 68], strides = [1, 1]} : vector<16x72xbf16> to vector<16x68xbf16>
    %26 = vector.extract_strided_slice %5 {offsets = [0, 4], sizes = [16, 68], strides = [1, 1]} : vector<16x72xbf16> to vector<16x68xbf16>
    %27 = vector.extract_strided_slice %7 {offsets = [0, 0], sizes = [16, 68], strides = [1, 1]} : vector<16x72xbf16> to vector<16x68xbf16>
    %28 = vector.extract_strided_slice %7 {offsets = [0, 4], sizes = [16, 68], strides = [1, 1]} : vector<16x72xbf16> to vector<16x68xbf16>
    %29 = tpu.concatenate %25, %26, %27, %28 in 0 : vector<16x68xbf16>, vector<16x68xbf16>, vector<16x68xbf16>, vector<16x68xbf16> -> vector<64x68xbf16>
    %c2_15 = arith.constant 2 : index
    %c0_16 = arith.constant 0 : index
    %c0_17 = arith.constant 0 : index
    %30 = vector.load %arg2[%c2_15, %c0_16, %c0_17] : memref<3x68x64xbf16, #tpu.memory_space<vmem>>, vector<1x68x64xbf16>
    %31 = vector.shape_cast %30 : vector<1x68x64xbf16> to vector<68x64xbf16>
    %cst_18 = arith.constant dense<0.000000e+00> : vector<64x64xf32>
    %32 = tpu.matmul %29, %31, %cst_18 {dimension_numbers = #tpu.dot_dimension_numbers<[1], [0], [0], [1], [0, 0, 1, 1], [], []>} : vector<64x68xbf16>, vector<68x64xbf16>, vector<64x64xf32> -> vector<64x64xf32>
    %33 = arith.addf %24, %32 : vector<64x64xf32>
    %34 = vector.extract_strided_slice %33 {offsets = [0, 0], sizes = [16, 64], strides = [1, 1]} : vector<64x64xf32> to vector<16x64xf32>
    %35 = vector.extract_strided_slice %33 {offsets = [16, 0], sizes = [16, 64], strides = [1, 1]} : vector<64x64xf32> to vector<16x64xf32>
    %36 = arith.maximumf %34, %35 : vector<16x64xf32>
    %37 = vector.extract_strided_slice %33 {offsets = [32, 0], sizes = [16, 64], strides = [1, 1]} : vector<64x64xf32> to vector<16x64xf32>
    %38 = vector.extract_strided_slice %33 {offsets = [48, 0], sizes = [16, 64], strides = [1, 1]} : vector<64x64xf32> to vector<16x64xf32>
    %39 = arith.maximumf %37, %38 : vector<16x64xf32>
    %40 = arith.maximumf %36, %39 : vector<16x64xf32>
    %c0_19 = arith.constant 0 : index
    %c0_20 = arith.constant 0 : index
    %41 = vector.load %arg3[%c0_19, %c0_20] : memref<1x64xf32, #tpu.memory_space<vmem>>, vector<1x64xf32>
    %42 = vector.broadcast %41 : vector<1x64xf32> to vector<16x64xf32>
    %43 = arith.addf %40, %42 : vector<16x64xf32>
    %cst_21 = arith.constant 0.000000e+00 : f32
    %44 = vector.broadcast %cst_21 : f32 to vector<16x64xf32>
    %45 = arith.maximumf %43, %44 : vector<16x64xf32>
    %46 = arith.truncf %45 : vector<16x64xf32> to vector<16x64xbf16>
    %c0_22 = arith.constant 0 : index
    %c0_23 = arith.constant 0 : index
    %47 = vector.load %arg4[%c0_22, %c0_23] : memref<16x64xbf16, #tpu.memory_space<vmem>>, vector<16x64xbf16>
    tpu.vector_store %arg4[%c0_22, %c0_23], %46 {strides = array<i32>} : memref<16x64xbf16, #tpu.memory_space<vmem>>, vector<16x64xbf16>,
    return
  }
  func.func @transform_0(%arg0: i32) -> (i32, i32, i32) {
    %c0_i32 = arith.constant 0 : i32
    %c0_i32_0 = arith.constant 0 : i32
    %c0_i32_1 = arith.constant 0 : i32
    return %c0_i32, %arg0, %c0_i32_0 : i32, i32, i32
  }
  func.func @transform_1(%arg0: i32) -> (i32, i32, i32) {
    %c0_i32 = arith.constant 0 : i32
    %c0_i32_0 = arith.constant 0 : i32
    %c0_i32_1 = arith.constant 0 : i32
    %c0_i32_2 = arith.constant 0 : i32
    return %c0_i32, %c0_i32_0, %c0_i32_1 : i32, i32, i32
  }
  func.func @transform_2(%arg0: i32) -> (i32, i32) {
    %c0_i32 = arith.constant 0 : i32
    %c0_i32_0 = arith.constant 0 : i32
    %c0_i32_1 = arith.constant 0 : i32
    return %c0_i32, %c0_i32_0 : i32, i32
  }
  func.func @transform_3(%arg0: i32) -> (i32, i32) {
    %c0_i32 = arith.constant 0 : i32
    %c0_i32_0 = arith.constant 0 : i32
    return %arg0, %c0_i32 : i32, i32
  }
}

</mosaic_0001>

<bundles_post_ra>
// kernel: tile.8
= control target key start
LH: loop header
LB: loop body
LE: loop exit
PB: predicated region body
PF: predicated region fallthrough
CT: control target
= control target key end

     0   :  { %s22_s0 = inlined_call_operand.vmem [shape: f32[8], index: 0, kind: input, shape index: {}]   ;;  %s23_s1 = inlined_call_operand.vmem [shape: f32[8,8], index: 1, kind: output, shape index: {}]  }
   0x1   :  { %v4_v0 = vld [vmem:[%s22_s0] ss:$0 sm:$0xff] }
   0x2   :  { %5 = vst [vmem:[%s23_s1] sm:$0xff] %v4_v0 }

// kernel: tile.9
= control target key start
LH: loop header
LB: loop body
LE: loop exit
PB: predicated region body
PF: predicated region fallthrough
CT: control target
= control target key end

     0   :  { %s67_s10 = smov 56   ;;  %s68_s11 = smov 40   ;;  %vm3_vm0 = vcmask 64512   ;;  %vm9_vm1 = vcmask 523712   ;;  %vm15_vm2 = vcmask 458112   ;;  %vm21_vm3 = vcmask 392512   ;;  %s111_s0 = inlined_call_operand.vmem [shape: f32[8,8], index: 0, kind: input, shape index: {}]   ;;  %s112_s1 = inlined_call_operand.vmem [shape: f32[1,64], index: 1, kind: output, shape index: {}]  }
   0x1   :  { %v53_v0 = vld [vmem:[%s111_s0 + $0x7] sm:$0x1]   ;;  %v55_v1 = vld [vmem:[%s111_s0 + $0x5] sm:$0x1]   ;;  %v54_v2 = vld [vmem:[%s111_s0 + $0x6] sm:$0x1]  }
   0x2   :  { %7 = vrot.lane.b32.xlu0 %v53_v0, %s67_s10  ;;  %19 = vrot.lane.b32.xlu1 %v55_v1, %s68_s11  ;;  %v56_v3 = vld [vmem:[%s111_s0 + $0x4] sm:$0x1]   ;;  %v2_v4 = vld [vmem:[%s111_s0] sm:$0x1]   ;;  %s69_s18 = smov 48   ;;  %s70_s19 = smov 32  }
   0x3   :  { %4 = vst.msk [vmem:[#allocation0] sm:$0x1] %vm3_vm0, %v2_v4   ;;  %v57_v5 = vld [vmem:[%s111_s0 + $0x3] sm:$0x1]   ;;  %v58_v6 = vld [vmem:[%s111_s0 + $0x2] sm:$0x1]  }
   0x4   :  { %s71_s24 = smov 24   ;;  %s72_s25 = smov 16   ;;  %v59_v7 = vld [vmem:[%s111_s0 + $0x1] sm:$0x1]   ;;  %vm27_vm4 = vcmask 326912   ;;  %vm33_vm5 = vcmask 261312  }
   0x5   :  { %s73_s0 = smov 8   ;;  %vm39_vm6 = vcmask 195712   ;;  %vm45_vm7 = vcmask 130112  }
   0x6   :  { %13 = vrot.lane.b32.xlu0 %v54_v2, %s69_s18  ;;  %25 = vrot.lane.b32.xlu1 %v56_v3, %s70_s19 }
   0xa   :  { %31 = vrot.lane.b32.xlu0 %v57_v5, %s71_s24  ;;  %37 = vrot.lane.b32.xlu1 %v58_v6, %s72_s25 }
   0xe   :  { %43 = vrot.lane.b32.xlu0 %v59_v7, %s73_s0 }
  0x74   :  { %v8_v8 = vpop.permute.xlu0 %7   ;;  %v20_v9 = vpop.permute.xlu1 %19  }
  0x75   :  { %10 = vst.msk [vmem:[#allocation0] sm:$0x1] %vm9_vm1, %v8_v8  }
  0x78   :  { %v14_v10 = vpop.permute.xlu0 %13   ;;  %v26_v11 = vpop.permute.xlu1 %25  }
  0x79   :  { %16 = vst.msk [vmem:[#allocation0] sm:$0x1] %vm15_vm2, %v14_v10  }
  0x7a   :  { %22 = vst.msk [vmem:[#allocation0] sm:$0x1] %vm21_vm3, %v20_v9  }
  0x7b   :  { %28 = vst.msk [vmem:[#allocation0] sm:$0x1] %vm27_vm4, %v26_v11  }
  0x7c   :  { %v32_v12 = vpop.permute.xlu0 %31   ;;  %v38_v13 = vpop.permute.xlu1 %37  }
  0x7d   :  { %34 = vst.msk [vmem:[#allocation0] sm:$0x1] %vm33_vm5, %v32_v12  }
  0x7e   :  { %40 = vst.msk [vmem:[#allocation0] sm:$0x1] %vm39_vm6, %v38_v13  }
  0x80   :  { %v44_v14 = vpop.permute.xlu0 %43  }
  0x81   :  { %46 = vst.msk [vmem:[#allocation0] sm:$0x1] %vm45_vm7, %v44_v14  }
  0x88   :  { %v50_v15 = vld [vmem:[#allocation0] sm:$0x1] }
  0x89   :  { %52 = vst [vmem:[%s112_s1] sm:$0x1] %v50_v15 }

// kernel: conv_block_forward.1
= control target key start
LH: loop header
LB: loop body
LE: loop exit
PB: predicated region body
PF: predicated region fallthrough
CT: control target
= control target key end

     0   :  { %vm93_vm0 = vcmask 556032   ;;  %s625_s16 = smov 124   ;;  %vm106_vm1 = vcmask 1041408   ;;  %vm427_vm2 = vcmask 519168   ;;  %s740_s0 = inlined_call_operand.vmem [shape: bf16[4,16,72], index: 0, kind: input, shape index: {}]   ;;  %s741_s1 = inlined_call_operand.vmem [shape: bf16[3,68,64], index: 1, kind: input, shape index: {}]   ;;  %s742_s2 = inlined_call_operand.vmem [shape: f32[1,64], index: 2, kind: input, shape index: {}]   ;;  %s743_s3 = inlined_call_operand.vmem [shape: bf16[16,64], index: 3, kind: output, shape index: {}]  }
   0x1   :  { %v606_v0 = vld [vmem:[%s740_s0] sm:$0xff]   ;;  %v607_v1 = vld [vmem:[%s740_s0 + $0x8] sm:$0xff]   ;;  %v655_v2 = vld [vmem:[%s740_s0 + $0x10] sm:$0xff]  }
   0x2   :  { %31 = vrot.lane.b32.xlu0 %v606_v0, %s625_s16  ;;  %549 = vmatprep.mubr.msk.bf16.mxu0 %vm93_vm0, %v606_v0  ;;  %v661_v3 = vld [vmem:[%s740_s0 + $0x18] sm:$0xff]   ;;  %v610_v4 = vld [vmem:[%s741_s1] sm:$0xff]   ;;  %v612_v6 = vld [vmem:[%s741_s1 + $0x8] sm:$0xff]  }
   0x3   :  { %531 = vmatprep.mubr.msk.bf16.mxu1 %vm93_vm0, %v607_v1  ;;  %54 = vrot.lane.b32.xlu1 %v655_v2, %s625_s16  ;;  %v611_v5 = vld [vmem:[%s741_s1 + $0x24] sm:$0xff]   ;;  %v613_v7 = vld [vmem:[%s741_s1 + $0x2c] sm:$0xff]   ;;  %v615_v9 = vld [vmem:[%s741_s1 + $0x34] sm:$0xff]  }
   0x4   :  { %539 = vmatprep.subr.bf16.mxu0 %v610_v4  ;;  %521 = vmatprep.subr.bf16.mxu1 %v611_v5  ;;  %v614_v8 = vld [vmem:[%s741_s1 + $0x10] sm:$0xff]   ;;  %v616_v10 = vld [vmem:[%s741_s1 + $0x18] sm:$0xff]   ;;  %v618_v12 = vld [vmem:[%s741_s1 + $0x20] ss:$0 sps:$4 sm:$0x33]  }
   0x5   :  { %540 = vmatpush3.bf16.msra.mxu0 %v610_v4  ;;  %522 = vmatpush3.bf16.msra.mxu1 %v611_v5  ;;  %v617_v11 = vld [vmem:[%s741_s1 + $0x3c] sm:$0xff]   ;;  %v619_v13 = vld [vmem:[%s741_s1 + $0x44] ss:$0 sps:$4 sm:$0x33]   ;;  %v209_v14 = vsel %vm106_vm1, %v618_v12, 0  ;;  %v620_v15 = vld [vmem:[%s741_s1 + $0x48] sm:$0xff]  }
   0x6   :  { %38 = vrot.lane.b32.xlu0 %v607_v1, %s625_s16  ;;  %541 = vmatprep.subr.bf16.mxu0 %v612_v6  ;;  %v108_v16 = vsel %vm106_vm1, %v619_v13, 0  ;;  %v621_v17 = vld [vmem:[%s741_s1 + $0x50] sm:$0xff]   ;;  %v622_v19 = vld [vmem:[%s741_s1 + $0x58] sm:$0xff]   ;;  %v623_v21 = vld [vmem:[%s741_s1 + $0x60] sm:$0xff]  }
   0x7   :  { %281 = vrot.lane.b32.xlu1 %v661_v3, %s625_s16  ;;  %523 = vmatprep.subr.bf16.mxu1 %v613_v7  ;;  %v624_v23 = vld [vmem:[%s741_s1 + $0x68] ss:$0 sps:$4 sm:$0x33]   ;;  %v489_v61 = vld [vmem:[%s742_s2] ss:$0 sm:$0xff] }
   0x8   :  { %v327_v24 = vsel %vm106_vm1, %v624_v23, 0 }
   0x9   :  { %542 = vmatpush3.bf16.msra.mxu0 %v612_v6  ;;  %524 = vmatpush3.bf16.msra.mxu1 %v613_v7 }
   0xa   :  { %543 = vmatprep.subr.bf16.mxu0 %v614_v8  ;;  %525 = vmatprep.subr.bf16.mxu1 %v615_v9 }
   0xd   :  { %544 = vmatpush3.bf16.msra.mxu0 %v614_v8  ;;  %526 = vmatpush3.bf16.msra.mxu1 %v615_v9 }
   0xe   :  { %545 = vmatprep.subr.bf16.mxu0 %v616_v10  ;;  %527 = vmatprep.subr.bf16.mxu1 %v617_v11 }
  0x11   :  { %546 = vmatpush3.bf16.msra.mxu0 %v616_v10  ;;  %528 = vmatpush3.bf16.msra.mxu1 %v617_v11 }
  0x12   :  { %602 = vmatprep.subr.msk.bf16.mxu0 %vm106_vm1, %v618_v12  ;;  %601 = vmatprep.subr.msk.bf16.mxu1 %vm106_vm1, %v619_v13 }
  0x15   :  { %548 = vmatpush3.bf16.msra.mxu0 %v209_v14  ;;  %530 = vmatpush3.bf16.msra.mxu1 %v108_v16 }
  0x16   :  { %557 = vmatprep.subr.bf16.mxu0 %v620_v15  ;;  %575 = vmatprep.subr.bf16.mxu1 %v620_v15 }
  0x74   :  { %v32_v18 = vpop.permute.xlu0 %31 }
  0x75   :  { %550 = vmatmul.mubr.msk.bf16.vlgmr.msra.gmra.mrb[0].mxu0 %vm93_vm0, %v32_v18  ;;  %v55_v22 = vpop.permute.xlu1 %54 }
  0x76   :  { %558 = vmatpush3.bf16.msra.mxu0 %v620_v15  ;;  %553 = vmatprep.mubr.msk.bf16.mxu0 %vm93_vm0, %v607_v1 }
  0x77   :  { %559 = vmatprep.subr.bf16.mxu0 %v621_v17 }
  0x78   :  { %v39_v20 = vpop.permute.xlu0 %38 }
  0x79   :  { %532 = vmatmul.mubr.msk.bf16.vlgmr.msra.gmra.mrb[0].mxu1 %vm93_vm0, %v39_v20  ;;  %v282_v25 = vpop.permute.xlu1 %281 }
  0x7a   :  { %580 = vmatpush3.bf16.msra.mxu1 %v620_v15  ;;  %560 = vmatpush3.bf16.msra.mxu0 %v621_v17 }
  0x7b   :  { %576 = vmatprep.subr.bf16.mxu1 %v621_v17  ;;  %561 = vmatprep.subr.bf16.mxu0 %v622_v19 }
  0x7c   :  { %535 = vmatprep.mubr.msk.bf16.mxu1 %vm93_vm0, %v655_v2 }
  0x7d   :  { %554 = vmatmul.mubr.msk.bf16.gmra.mrb[4].mxu0 %vm93_vm0, %v39_v20 }
  0x7e   :  { %581 = vmatpush3.bf16.msra.mxu1 %v621_v17  ;;  %562 = vmatpush3.bf16.msra.mxu0 %v622_v19 }
  0x7f   :  { %577 = vmatprep.subr.bf16.mxu1 %v622_v19  ;;  %563 = vmatprep.subr.bf16.mxu0 %v623_v21 }
  0x80   :  { %567 = vmatprep.mubr.msk.bf16.mxu0 %vm93_vm0, %v655_v2 }
  0x81   :  { %536 = vmatmul.mubr.msk.bf16.gmra.mrb[4].mxu1 %vm93_vm0, %v55_v22 }
  0x82   :  { %582 = vmatpush3.bf16.msra.mxu1 %v622_v19  ;;  %564 = vmatpush3.bf16.msra.mxu0 %v623_v21 }
  0x83   :  { %578 = vmatprep.subr.bf16.mxu1 %v623_v21  ;;  %603 = vmatprep.subr.msk.bf16.mxu0 %vm106_vm1, %v624_v23 }
  0x84   :  { %571 = vmatprep.mubr.msk.bf16.mxu1 %vm93_vm0, %v661_v3 }
  0x86   :  { %583 = vmatpush3.bf16.msra.mxu1 %v623_v21  ;;  %566 = vmatpush3.bf16.msra.mxu0 %v327_v24 }
  0x87   :  { %604 = vmatprep.subr.msk.bf16.mxu1 %vm106_vm1, %v624_v23 }
  0x89   :  { %568 = vmatmul.mubr.msk.bf16.vlgmr.msra.gmra.mrb[0].mxu0 %vm93_vm0, %v55_v22 }
  0x8a   :  { %584 = vmatpush3.bf16.msra.mxu1 %v327_v24 }
  0x8d   :  { %572 = vmatmul.mubr.msk.bf16.vlgmr.msra.gmra.mrb[8].mxu1 %vm93_vm0, %v282_v25 }
 0x14c   :  { %v533_v26 = vpop.f32.mrb[0].mxu1 }
 0x14d   :  { %v144_v27 = vpop.f32.mrb[1].mxu1 }
 0x14e   :  { %v534_v28 = vpop.f32.mrb[2].mxu1 }
 0x14f   :  { %v147_v29 = vpop.f32.mrb[3].mxu1 }
 0x150   :  { %v555_v30 = vpop.f32.mrb[4].mxu0 }
 0x151   :  { %v261_v31 = vpop.f32.mrb[5].mxu0 }
 0x152   :  { %v556_v32 = vpop.f32.mrb[6].mxu0 }
 0x153   :  { %v264_v33 = vpop.f32.mrb[7].mxu0 }
 0x154   :  { %v537_v34 = vpop.f32.mrb[4].mxu1 }
 0x155   :  { %v270_v35 = vadd.f32 %v555_v30, %v537_v34  ;;  %v160_v36 = vpop.f32.mrb[5].mxu1 }
 0x156   :  { %v262_v37 = vadd.f32 %v261_v31, %v160_v36  ;;  %v538_v38 = vpop.f32.mrb[6].mxu1 }
 0x157   :  { %v273_v39 = vadd.f32 %v556_v32, %v538_v38  ;;  %v163_v40 = vpop.f32.mrb[7].mxu1 }
 0x158   :  { %v265_v41 = vadd.f32 %v264_v33, %v163_v40 }
 0x15c   :  { %v569_v42 = vpop.f32.mrb[0].mxu0 }
 0x15d   :  { %v585_v43 = vadd.f32 %v569_v42, %v533_v26  ;;  %v363_v44 = vpop.f32.mrb[1].mxu0 }
 0x15e   :  { %v586_v45 = vadd.f32 %v363_v44, %v144_v27  ;;  %v570_v46 = vpop.f32.mrb[2].mxu0 }
 0x15f   :  { %v587_v47 = vadd.f32 %v570_v46, %v534_v28  ;;  %v366_v48 = vpop.f32.mrb[3].mxu0 }
 0x160   :  { %v402_v49 = vmax.f32 %v586_v45, %v585_v43  ;;  %v588_v50 = vadd.f32 %v366_v48, %v147_v29  ;;  %v573_v51 = vpop.f32.mrb[8].mxu1 }
 0x161   :  { %v400_v52 = vadd.f32 %v573_v51, %v270_v35  ;;  %v379_v53 = vpop.f32.mrb[9].mxu1 }
 0x162   :  { %v403_v54 = vmax.f32 %v588_v50, %v587_v47  ;;  %v398_v55 = vadd.f32 %v379_v53, %v262_v37  ;;  %v574_v56 = vpop.f32.mrb[10].mxu1 }
 0x163   :  { %v401_v57 = vadd.f32 %v574_v56, %v273_v39  ;;  %v382_v58 = vpop.f32.mrb[11].mxu1 }
 0x164   :  { %v404_v59 = vmax.f32 %v398_v55, %v400_v52  ;;  %v399_v60 = vadd.f32 %v382_v58, %v265_v41 }
 0x166   :  { %v406_v62 = vmax.f32 %v402_v49, %v404_v59  ;;  %v405_v63 = vmax.f32 %v399_v60, %v401_v57 }
 0x168   :  { %v415_v0 = vadd.f32 %v489_v61, %v406_v62  ;;  %v407_v1 = vmax.f32 %v403_v54, %v405_v63 }
 0x16a   :  { %v417_v2 = vmax.f32 %v415_v0, 0.0  ;;  %v416_v3 = vadd.f32 %v489_v61, %v407_v1 }
 0x16c   :  { %v492_v4 = vpack.c.bf16 %v417_v2, %v417_v2  ;;  %v418_v5 = vmax.f32 %v416_v3, 0.0 }
 0x16e   :  { %428 = vst.msk [vmem:[%s743_s3] sm:$0xf] %vm427_vm2, %v492_v4  ;;  %v493_v6 = vpack.c.bf16 %v418_v5, %v418_v5 }
 0x170   :  { %429 = vst.msk [vmem:[%s743_s3 + $0x4] sm:$0xf] %vm427_vm2, %v493_v6 }

</bundles_post_ra>
